<compile_context>
chip_gen: v7x
topology: tpu7x:2x2x1
jax: 0.10.0
libtpu: 0.0.40
codegen_flags: <defaults>
</compile_context>

<pallas_src>
import functools

import jax
import jax.numpy as jnp
from jax.experimental import pallas as pl
from jax.experimental.pallas import tpu as pltpu


# ---------------------------------------------------------------------------
# Contraction-order choice: MXU tile count, not raw MACs.
# ---------------------------------------------------------------------------
def _mxu_tiles(m, k, n, mxu_lanes=128):
    return pl.cdiv(m, 8) * pl.cdiv(k, mxu_lanes) * pl.cdiv(n, mxu_lanes)


def _agg_first(n_nodes, f_in, f_out, mxu_lanes=128):
    """True -> (A @ X) @ W is fewer MXU passes; tie -> False (A @ (X @ W))."""
    cost_agg = (_mxu_tiles(n_nodes, n_nodes, f_in, mxu_lanes)
                + _mxu_tiles(n_nodes, f_in, f_out, mxu_lanes))
    cost_xw = (_mxu_tiles(n_nodes, f_in, f_out, mxu_lanes)
               + _mxu_tiles(n_nodes, n_nodes, f_out, mxu_lanes))
    return cost_agg < cost_xw


# ---------------------------------------------------------------------------
# Fused Pallas kernel:
#   out = A_hat @ ( relu(A_hat @ Z @ W1 + b1) @ W2 ) + b2
# Operands are used in their storage dtype (pre-cast at init); all matmuls
# accumulate in f32; H1 lives in vregs (no scratch round-trip).
# ---------------------------------------------------------------------------
def _decoder_kernel(a_ref, z_ref, w1_ref, b1_ref, w2_ref, b2_ref, o_ref,
                    *, agg_first_1, agg_first_2):
    a = a_ref[...]

    # ---- layer 1: relu(A_hat @ Z @ W1 + b1) ----
    z = z_ref[...]
    w1 = w1_ref[...]
    if agg_first_1:
        t = jnp.dot(a, z, preferred_element_type=jnp.float32)
        h = jnp.dot(t, w1, preferred_element_type=jnp.float32)
    else:
        t = jnp.dot(z, w1, preferred_element_type=jnp.float32)
        h = jnp.dot(a, t, preferred_element_type=jnp.float32)
    # f32 epilogue (bias + ReLU); H1 stays in vregs, never touches VMEM scratch.
    h1 = jnp.maximum(h + b1_ref[...], 0.0)

    # ---- layer 2: A_hat @ H1 @ W2 + b2 ----
    w2 = w2_ref[...]
    if agg_first_2:
        t2 = jnp.dot(a, h1, preferred_element_type=jnp.float32)
        out = jnp.dot(t2, w2, preferred_element_type=jnp.float32)
    else:
        t2 = jnp.dot(h1, w2, preferred_element_type=jnp.float32)
        out = jnp.dot(a, t2, preferred_element_type=jnp.float32)
    o_ref[...] = (out + b2_ref[...]).astype(o_ref.dtype)


# ---------------------------------------------------------------------------
# One-time prep (NOT on the hot path): cast the heavy static operands to the
# compute dtype and pre-reshape biases.  Call once per (graph, params).
# ---------------------------------------------------------------------------
def prepare_decoder_inputs(a_hat, params, compute_dtype=jnp.bfloat16):
    return {
        "a_hat": a_hat.astype(compute_dtype),
        "w1": params["w1"].astype(compute_dtype),
        "b1": params["b1"].reshape(1, -1).astype(jnp.float32),
        "w2": params["w2"].astype(compute_dtype),
        "b2": params["b2"].reshape(1, -1).astype(jnp.float32),
    }


# ---------------------------------------------------------------------------
# Forward wrapper (hot path): one pallas_call, no host-side array ops.
# ---------------------------------------------------------------------------
def attribute_decoder(z, prep):
    a_hat, w1, b1, w2, b2 = (prep["a_hat"], prep["w1"], prep["b1"],
                             prep["w2"], prep["b2"])
    n, f_in = z.shape
    hidden = w1.shape[1]
    f_out = w2.shape[1]

    agg_first_1 = _agg_first(n, f_in, hidden)
    agg_first_2 = _agg_first(n, hidden, f_out)

    # Advisory cost estimate for XLA's scheduler (overhead-dominated call).
    l1 = (2 * (n * n * f_in + n * f_in * hidden) if agg_first_1
          else 2 * (n * f_in * hidden + n * n * hidden))
    l2 = (2 * (n * n * hidden + n * hidden * f_out) if agg_first_2
          else 2 * (n * hidden * f_out + n * n * f_out))
    flops = l1 + l2 + 3 * n * hidden + 2 * n * f_out
    bytes_accessed = (a_hat.nbytes + z.nbytes + w1.nbytes + b1.nbytes
                      + w2.nbytes + b2.nbytes + n * f_out * 4)

    kernel = functools.partial(
        _decoder_kernel, agg_first_1=agg_first_1, agg_first_2=agg_first_2)

    # Small graph: everything fits in VMEM as a single block (grid=()).
    return pl.pallas_call(
        kernel,
        out_shape=jax.ShapeDtypeStruct((n, f_out), jnp.float32),
        in_specs=[
            pl.BlockSpec((n, n), lambda: (0, 0)),
            pl.BlockSpec((n, f_in), lambda: (0, 0)),
            pl.BlockSpec((f_in, hidden), lambda: (0, 0)),
            pl.BlockSpec((1, hidden), lambda: (0, 0)),
            pl.BlockSpec((hidden, f_out), lambda: (0, 0)),
            pl.BlockSpec((1, f_out), lambda: (0, 0)),
        ],
        out_specs=pl.BlockSpec((n, f_out), lambda: (0, 0)),
        cost_estimate=pl.CostEstimate(
            flops=flops, transcendentals=0, bytes_accessed=bytes_accessed),
    )(a_hat, z, w1, b1, w2, b2)


# ---------------------------------------------------------------------------
# Glue: normalized adjacency from edge_index, matching torch_geometric's
# gcn_norm with add_remaining_self_loops (self-loop added only where missing).
# Compute ONCE per (static) graph and reuse.
# ---------------------------------------------------------------------------
def normalized_adjacency(edge_index, num_nodes):
    """A_hat = D^{-1/2} (A + I_remaining) D^{-1/2}, dense, float32."""
    src, dst = edge_index[0], edge_index[1]
    adj = jnp.zeros((num_nodes, num_nodes), dtype=jnp.float32)
    adj = adj.at[dst, src].add(1.0)                      # row i gathers from j: j->i
    diag = jnp.diagonal(adj)
    adj = adj + jnp.diag(jnp.where(diag > 0, 0.0, 1.0))  # add only missing self-loops
    deg = jnp.sum(adj, axis=1)
    d_inv_sqrt = jnp.where(deg > 0, jax.lax.rsqrt(deg), 0.0)
    return d_inv_sqrt[:, None] * adj * d_inv_sqrt[None, :]


def attribute_decoder_from_edge_index(z, edge_index, params,
                                      compute_dtype=jnp.bfloat16):
    """Drop-in equivalent of the PyTorch forward(z, edge_index) signature.
    (Rebuilds A_hat and re-preps params every call; prefer prepare_ + reuse.)"""
    a_hat = normalized_adjacency(edge_index, z.shape[0])
    prep = prepare_decoder_inputs(a_hat, params, compute_dtype)
    return attribute_decoder(z, prep)


def init_params(key, in_channels, hidden, out_channels):
    k1, k2 = jax.random.split(key)
    # Glorot-style deterministic init (matches GCNConv's glorot + zero bias).
    s1 = jnp.sqrt(6.0 / (in_channels + hidden))
    s2 = jnp.sqrt(6.0 / (hidden + out_channels))
    return {
        "w1": jax.random.uniform(k1, (in_channels, hidden), jnp.float32, -s1, s1),
        "b1": jnp.zeros((hidden,), jnp.float32),
        "w2": jax.random.uniform(k2, (hidden, out_channels), jnp.float32, -s2, s2),
        "b2": jnp.zeros((out_channels,), jnp.float32),
    }


if __name__ == "__main__":
    key = jax.random.PRNGKey(0)
    k_z, k_p = jax.random.split(key)

    num_nodes = 8
    in_channels = 16
    hidden = 128          # fixed by the module: GCNConv(in_channels, 128)
    out_channels = 16

    # Node latent embeddings z: (N, in_channels)
    z = jax.random.normal(k_z, (num_nodes, in_channels), dtype=jnp.float32)

    # Simple undirected ring graph as edge_index (2, E)
    src = jnp.arange(num_nodes, dtype=jnp.int32)
    dst = (src + 1) % num_nodes
    edge_index = jnp.stack(
        [jnp.concatenate([src, dst]), jnp.concatenate([dst, src])], axis=0
    )

    params = init_params(k_p, in_channels, hidden, out_channels)

    # A_hat is static across forward calls: build + prep ONCE, outside the
    # decoder's hot path.
    a_hat = normalized_adjacency(edge_index, num_nodes)

    # Pure-JAX reference of the module's forward pass.
    ref_h = jnp.maximum(a_hat @ (z @ params["w1"]) + params["b1"], 0.0)
    ref = a_hat @ (ref_h @ params["w2"]) + params["b2"]

    # 1) Exact path: f32 storage everywhere (tight tolerance).
    prep_f32 = prepare_decoder_inputs(a_hat, params, compute_dtype=jnp.float32)
    out_f32 = jax.block_until_ready(attribute_decoder(z, prep_f32))
    assert out_f32.shape == (num_nodes, out_channels)
    assert jnp.allclose(out_f32, ref, atol=1e-4, rtol=1e-4)

    # 2) Fast path: bf16 storage for A_hat / W1 / W2, f32 accumulation.
    #    Dominant error source is the bf16 rounding of A_hat's degree-scaled
    #    aggregation weights (~1e-3 relative), hence the loosened tolerance.
    prep_bf16 = prepare_decoder_inputs(a_hat, params, compute_dtype=jnp.bfloat16)
    out = jax.block_until_ready(attribute_decoder(z, prep_bf16))
    assert out.shape == (num_nodes, out_channels)
    assert jnp.allclose(out, ref, atol=5e-2, rtol=5e-2)

    print("KERNEL_OK")
</pallas_src>

<mosaic_0001>
module attributes {stable_mosaic.version = 11 : i64} {
  func.func @_decoder_kernel(%arg0: memref<8x8xf32, #tpu.memory_space<vmem>>, %arg1: memref<8x16xf32, #tpu.memory_space<vmem>>, %arg2: memref<16x128xf32, #tpu.memory_space<vmem>>, %arg3: memref<1x128xf32, #tpu.memory_space<vmem>>, %arg4: memref<128x16xf32, #tpu.memory_space<vmem>>, %arg5: memref<1x16xf32, #tpu.memory_space<vmem>>, %arg6: memref<8x16xf32, #tpu.memory_space<vmem>>) attributes {dimension_semantics = [], scalar_prefetch = 0 : i64, scratch_operands = 0 : i64, tpu.core_type = #tpu.core_type<tc>} {
    %c0 = arith.constant 0 : index
    %c0_0 = arith.constant 0 : index
    %0 = vector.load %arg0[%c0, %c0_0] : memref<8x8xf32, #tpu.memory_space<vmem>>, vector<8x8xf32>
    %c0_1 = arith.constant 0 : index
    %c0_2 = arith.constant 0 : index
    %1 = vector.load %arg1[%c0_1, %c0_2] : memref<8x16xf32, #tpu.memory_space<vmem>>, vector<8x16xf32>
    %c0_3 = arith.constant 0 : index
    %c0_4 = arith.constant 0 : index
    %2 = vector.load %arg2[%c0_3, %c0_4] : memref<16x128xf32, #tpu.memory_space<vmem>>, vector<16x128xf32>
    %cst = arith.constant dense<0.000000e+00> : vector<8x128xf32>
    %3 = tpu.matmul %1, %2, %cst {dimension_numbers = #tpu.dot_dimension_numbers<[1], [0], [0], [1], [0, 0, 1, 1], [], []>} : vector<8x16xf32>, vector<16x128xf32>, vector<8x128xf32> -> vector<8x128xf32>
    %cst_5 = arith.constant dense<0.000000e+00> : vector<8x128xf32>
    %4 = tpu.matmul %0, %3, %cst_5 {dimension_numbers = #tpu.dot_dimension_numbers<[1], [0], [0], [1], [0, 0, 1, 1], [], []>} : vector<8x8xf32>, vector<8x128xf32>, vector<8x128xf32> -> vector<8x128xf32>
    %c0_6 = arith.constant 0 : index
    %c0_7 = arith.constant 0 : index
    %5 = vector.load %arg3[%c0_6, %c0_7] : memref<1x128xf32, #tpu.memory_space<vmem>>, vector<1x128xf32>
    %6 = vector.broadcast %5 : vector<1x128xf32> to vector<8x128xf32>
    %7 = arith.addf %4, %6 : vector<8x128xf32>
    %cst_8 = arith.constant 0.000000e+00 : f32
    %8 = vector.broadcast %cst_8 : f32 to vector<8x128xf32>
    %9 = arith.maximumf %7, %8 : vector<8x128xf32>
    %c0_9 = arith.constant 0 : index
    %c0_10 = arith.constant 0 : index
    %10 = vector.load %arg4[%c0_9, %c0_10] : memref<128x16xf32, #tpu.memory_space<vmem>>, vector<128x16xf32>
    %cst_11 = arith.constant dense<0.000000e+00> : vector<8x16xf32>
    %11 = tpu.matmul %9, %10, %cst_11 {dimension_numbers = #tpu.dot_dimension_numbers<[1], [0], [0], [1], [0, 0, 1, 1], [], []>} : vector<8x128xf32>, vector<128x16xf32>, vector<8x16xf32> -> vector<8x16xf32>
    %cst_12 = arith.constant dense<0.000000e+00> : vector<8x16xf32>
    %12 = tpu.matmul %0, %11, %cst_12 {dimension_numbers = #tpu.dot_dimension_numbers<[1], [0], [0], [1], [0, 0, 1, 1], [], []>} : vector<8x8xf32>, vector<8x16xf32>, vector<8x16xf32> -> vector<8x16xf32>
    %c0_13 = arith.constant 0 : index
    %c0_14 = arith.constant 0 : index
    %13 = vector.load %arg5[%c0_13, %c0_14] : memref<1x16xf32, #tpu.memory_space<vmem>>, vector<1x16xf32>
    %14 = vector.broadcast %13 : vector<1x16xf32> to vector<8x16xf32>
    %15 = arith.addf %12, %14 : vector<8x16xf32>
    %c0_15 = arith.constant 0 : index
    %c0_16 = arith.constant 0 : index
    %16 = vector.load %arg6[%c0_15, %c0_16] : memref<8x16xf32, #tpu.memory_space<vmem>>, vector<8x16xf32>
    tpu.vector_store %arg6[%c0_15, %c0_16], %15 {strides = array<i32>} : memref<8x16xf32, #tpu.memory_space<vmem>>, vector<8x16xf32>,
    return
  }
}

</mosaic_0001>

<bundles_post_ra>
// kernel: tpu_custom_call.1
= control target key start
LH: loop header
LB: loop body
LE: loop exit
PB: predicated region body
PF: predicated region fallthrough
CT: control target
= control target key end

     0   :  { %v498_v2 = vmov 0.0|0.0   ;;  %vm499_vm0 = vmmov 0   ;;  %v500_v4 = vmov 0.0   ;;  %s623_s0 = inlined_call_operand.vmem [shape: f32[8,8], index: 0, kind: input, shape index: {}]   ;;  %s624_s1 = inlined_call_operand.vmem [shape: f32[8,16], index: 1, kind: input, shape index: {}]   ;;  %s625_s2 = inlined_call_operand.vmem [shape: f32[16,128], index: 2, kind: input, shape index: {}]   ;;  %s626_s3 = inlined_call_operand.vmem [shape: f32[1,128], index: 3, kind: input, shape index: {}]   ;;  %s627_s4 = inlined_call_operand.vmem [shape: f32[128,16], index: 4, kind: input, shape index: {}]   ;;  %s628_s5 = inlined_call_operand.vmem [shape: f32[1,16], index: 5, kind: input, shape index: {}]   ;;  %s629_s6 = inlined_call_operand.hbm [shape: f32[8,16], index: 6, kind: output, shape index: {}]  }
   0x1   :  { %v26_v0 = vld [vmem:[%s625_s2] sm:$0xff]  ;;  %v27_v1 = vld [vmem:[%s625_s2 + $0x8] sm:$0xff]  ;;  %443 = vmatprep.subr.bf16.mxu0 %v498_v2  ;;  %395 = vmatprep.mubr.msk.f32.mxu0 %vm499_vm0, %v500_v4 }
   0x2   :  { %v444_v3 = vpack.c.bf16 %v27_v1, %v26_v0 }
   0x3   :  { %11 = vsyncpa [#allocation3], 0  ;;  %446 = vmatprep.subr.bf16.mxu1 %v498_v2  ;;  %435 = vmatprep.mubr.msk.f32.mxu1 %vm499_vm0, %v500_v4  ;;  %v25_v5 = vld [vmem:[%s624_s1] sm:$0xff]  ;;  %vm28_vm1 = vcmask 130048   ;;  %v185_v7 = vld [vmem:[%s627_s4 + $0x8] sm:$0xff]  ;;  %vm109_vm2 = vcmask 64512  }
   0x4   :  { %445 = vmatpush3.bf16.msra.mxu0 %v444_v3  ;;  %v184_v6 = vld [vmem:[%s627_s4] sm:$0xff]  ;;  %v186_v8 = vld [vmem:[%s627_s4 + $0x10] sm:$0xff]  ;;  %v187_v10 = vld [vmem:[%s627_s4 + $0x18] sm:$0xff] }
   0x5   :  { %398 = vmatprep.subr.mxu0 %v500_v4  ;;  %v447_v9 = vpack.c.bf16 %v185_v7, %v184_v6  ;;  %v450_v11 = vpack.c.bf16 %v187_v10, %v186_v8  ;;  %v188_v12 = vld [vmem:[%s627_s4 + $0x20] sm:$0xff]  ;;  %v189_v13 = vld [vmem:[%s627_s4 + $0x28] sm:$0xff]  ;;  %v190_v15 = vld [vmem:[%s627_s4 + $0x30] sm:$0xff] }
   0x6   :  { %v453_v14 = vpack.c.bf16 %v189_v13, %v188_v12  ;;  %v191_v16 = vld [vmem:[%s627_s4 + $0x38] sm:$0xff]  ;;  %v192_v18 = vld [vmem:[%s627_s4 + $0x40] sm:$0xff]  ;;  %v193_v19 = vld [vmem:[%s627_s4 + $0x48] sm:$0xff] }
   0x7   :  { %396 = vmatmul.mubr.msk.f32.vlgmr.msra.gmra.mrb[0].mxu0 %vm28_vm1, %v25_v5  ;;  %448 = vmatpush3.bf16.msra.mxu1 %v447_v9  ;;  %v456_v17 = vpack.c.bf16 %v191_v16, %v190_v15  ;;  %v459_v20 = vpack.c.bf16 %v193_v19, %v192_v18  ;;  %v194_v21 = vld [vmem:[%s627_s4 + $0x50] sm:$0xff]  ;;  %v195_v22 = vld [vmem:[%s627_s4 + $0x58] sm:$0xff]  ;;  %v196_v24 = vld [vmem:[%s627_s4 + $0x60] sm:$0xff] }
   0x8   :  { %400 = vmatprep.mubr.msk.f32.mxu0 %vm499_vm0, %v500_v4  ;;  %449 = vmatprep.subr.bf16.mxu1 %v498_v2  ;;  %v462_v23 = vpack.c.bf16 %v195_v22, %v194_v21  ;;  %v197_v25 = vld [vmem:[%s627_s4 + $0x68] sm:$0xff]  ;;  %v24_v27 = vld [vmem:[%s623_s0] sm:$0xff]  ;;  %v198_v30 = vld [vmem:[%s627_s4 + $0x70] sm:$0xff] }
   0x9   :  { %v465_v26 = vpack.c.bf16 %v197_v25, %v196_v24  ;;  %v199_v31 = vld [vmem:[%s627_s4 + $0x78] sm:$0xff]  ;;  %v363_v33 = vld [vmem:[%s626_s3] ss:$0 sm:$0xff]  ;;  %s501_s4 = smov [#allocation2]  }
   0xa   :  { %v468_v32 = vpack.c.bf16 %v199_v31, %v198_v30  ;;  %v365_v40 = vld [vmem:[%s628_s5] ss:$0 sm:$0xff]  ;;  %s354_s12 = sshll.u32 %s501_s4, 4  ;;  %s355_s12 = int_to_ptr.vmem [resolvable:$true] %s354_s12 }
   0xb   :  { %451 = vmatpush3.bf16.msra.mxu1 %v450_v11  ;;  %s474_s3 = scalar_lea.vmem %s355_s12, 128  ;;  %p479_p1 = scmp.lt.s32.totalorder %s355_s12, %s355_s12 }
   0xc   :  { %452 = vmatprep.subr.bf16.mxu1 %v498_v2  ;;  %p475_p0 = scmp.ne.s32.totalorder %s355_s12, %s474_s3  ;;  %p480_p2 = scmp.lt.s32.totalorder %s474_s3, %s474_s3 }
   0xe   :  { %p481_p3 = por %p480_p2, %p479_p1 }
   0xf   :  { %454 = vmatpush3.bf16.msra.mxu1 %v453_v14 }
  0x10   :  { %455 = vmatprep.subr.bf16.mxu1 %v498_v2  ;;  %p482_p4 = pnand %p481_p3, %p475_p0 }
  0x13   :  { %457 = vmatpush3.bf16.msra.mxu1 %v456_v17 }
  0x14   :  { %458 = vmatprep.subr.bf16.mxu1 %v498_v2 }
  0x17   :  { %460 = vmatpush3.bf16.msra.mxu1 %v459_v20 }
  0x18   :  { %461 = vmatprep.subr.bf16.mxu1 %v498_v2 }
  0x1b   :  { %463 = vmatpush3.bf16.msra.mxu1 %v462_v23 }
  0x1c   :  { %464 = vmatprep.subr.bf16.mxu1 %v498_v2 }
  0x1f   :  { %466 = vmatpush3.bf16.msra.mxu1 %v465_v26 }
  0x20   :  { %467 = vmatprep.subr.bf16.mxu1 %v498_v2 }
  0x23   :  { %469 = vmatpush3.bf16.msra.mxu1 %v468_v32 }
  0xda   :  { %v98_v28 = vpop.f32.mrb[0].mxu0 }
  0xdb   :  { %v397_v29 = vpop.f32.mrb[1].mxu0  ;;  %399 = vmatpush3.msra.mxu0 %v98_v28 }
  0xdc   :  { %401 = vmatmul.mubr.msk.f32.vlgmr.msra.gmra.mrb[2].mxu0 %vm109_vm2, %v24_v27  ;;  %438 = vmatprep.subr.mxu0 %v500_v4 }
  0xdd   :  { %440 = vmatprep.mubr.msk.f32.mxu0 %vm499_vm0, %v500_v4 }
 0x1af   :  { %v179_v34 = vpop.f32.mrb[2].mxu0 }
 0x1b0   :  { %v180_v35 = vadd.f32 %v363_v33, %v179_v34  ;;  %v402_v36 = vpop.f32.mrb[3].mxu0 }
 0x1b2   :  { %v183_v37 = vmax.f32 %v180_v35, 0.0 }
 0x1b4   :  { %436 = vmatmul.mubr.f32.vlgmr.msra.gmra.mrb[0].mxu1 %v183_v37 }
 0x287   :  { %v266_v38 = vpop.f32.mrb[0].mxu1 }
 0x288   :  { %v437_v39 = vpop.f32.mrb[1].mxu1  ;;  %439 = vmatpush3.msra.mxu0 %v266_v38 }
 0x289   :  { %441 = vmatmul.mubr.msk.f32.vlgmr.msra.gmra.mrb[4].mxu0 %vm109_vm2, %v24_v27 }
 0x35c   :  { %v343_v41 = vpop.f32.mrb[4].mxu0 }
 0x35d   :  { %v344_v42 = vadd.f32 %v365_v40, %v343_v41  ;;  %v442_v43 = vpop.f32.mrb[5].mxu0 }
 0x35f   :  { %347 = vst.msk [vmem:[#allocation2] sm:$0xff] %vm28_vm1, %v344_v42 }
 0x360   :  { %485 = shalt.err (!%p482_p4)
}
 0x361   :  { %s486_s15 = scalar_lea.hbm %s629_s6, 128 }
 0x362   :  { %p487_p5 = scmp.ne.s32.totalorder %s629_s6, %s486_s15  ;;  %p490_p6 = scmp.lt.u32.totalorder %s486_s15, %s629_s6 }
 0x364   :  { %p492_p7 = pnand %p490_p6, %p487_p5 }
 0x366   :  { %495 = shalt.err (!%p492_p7)
}
 0x367   :  { %357 = dma.vmem_to_hbm [thread:$0]  %s355_s12, 128, %s629_s6, [#allocation3]  }
 0x368   :  { %496 = dma.done.wait [#allocation3], 128  }
 0x369   :  { %497 = vsyncadd [#allocation3], 4294967168 }
 0x36a   :  { %361 = vsyncpa [#allocation3], 1 }

</bundles_post_ra>
